<compile_context>
chip_gen: v5e
topology: v5e:2x2
jax: 0.10.0
libtpu: 0.0.40
codegen_flags: <defaults>
</compile_context>

<pallas_src>
import math
from functools import partial

import numpy as np
import jax
import jax.numpy as jnp
from jax.experimental import pallas as pl
from jax.experimental.pallas import tpu as pltpu


def spe_kernel(pos_ref, inv_freq_ref, out_ref, *, padding_idx):
    """pos_ref: (tb, ts, 1) int32 positions; inv_freq_ref: (1, 1, half) f32;
    out_ref: (tb, ts, D) f32 embeddings."""
    pos_i = pos_ref[...]                                     # (tb, ts, 1) int32
    # Padding tokens have position == padding_idx exactly (that table row is
    # zeroed in the PyTorch module); compare on int32, no float equality.
    mask = (pos_i != padding_idx).astype(jnp.float32)        # (tb, ts, 1)
    positions = pos_i.astype(jnp.float32)

    inv_freq = inv_freq_ref[...]                             # (1, 1, half)
    half = inv_freq.shape[-1]
    angle = positions * inv_freq                             # (tb, ts, half)

    s = jnp.sin(angle) * mask
    c = jnp.cos(angle) * mask

    if half % 128 == 0:
        # Lane-aligned halves: two direct unmasked stores, no concat temporary.
        out_ref[:, :, 0:half] = s
        out_ref[:, :, half:] = c
    else:
        # Small / unaligned D: single full-block store.
        # (For D % 128 != 0 a fully lane-dense (B, S*D) output layout would be
        #  faster still; kept simple here since typical D >= 128 is unaffected.)
        out_ref[...] = jnp.concatenate([s, c], axis=-1)


def _round_up(x, m):
    return ((x + m - 1) // m) * m


def _largest_divisor_leq(n, limit):
    limit = max(1, min(n, limit))
    for d in range(limit, 0, -1):
        if n % d == 0:
            return d
    return 1


def _vmem_capacity_bytes():
    try:
        info = pltpu.get_tpu_info()
        cap = getattr(info, "vmem_capacity_bytes", None)
        if cap:
            return int(cap)
    except Exception:
        pass
    return 64 << 20   # conservative fallback (v7x-sized VMEM)


def _choose_tiling(b, s, d, itemsize=4):
    """Pick (tb, ts, s_pad, vmem_limit).  tb divides b, ts is a multiple of 8,
    s_pad is a multiple of ts, and the (tb, ts, d) output block (plus the
    lane-padded (tb, ts, 1) positions block and sin/cos temporaries, double
    buffered) stays within the scoped VMEM limit for the current chip."""
    vmem_cap = _vmem_capacity_bytes()
    if vmem_cap >= (96 << 20):          # v5e / v6e: 128 MiB physical VMEM
        block_budget = 8 << 20
        vmem_limit = 64 << 20
    else:                               # v7x: 64 MiB physical VMEM
        block_budget = 4 << 20
        vmem_limit = 32 << 20

    # Cost of one (batch, seq) "row" of a block: d f32 output elements plus the
    # positions element, which is lane-padded to 128 lanes in VMEM.
    bytes_per_row = d * itemsize + 128 * 4
    max_rows = max(8, (block_budget // bytes_per_row) // 8 * 8)

    s8 = _round_up(s, 8)
    ts = max(8, min(s8, max_rows) // 8 * 8)
    tb = _largest_divisor_leq(b, max(1, max_rows // ts))
    s_pad = _round_up(s8, ts)

    # Guarantee >= 2 grid steps when possible (v7x 2-TC sharding + pipelining).
    if (b // tb) * (s_pad // ts) < 2:
        if b >= 2:
            tb = _largest_divisor_leq(b, max(1, b // 2))
        elif s8 >= 16:
            ts = max(8, (s8 // 2) // 8 * 8)
            s_pad = _round_up(s8, ts)

    return tb, ts, s_pad, vmem_limit


def sinusoidal_positional_embedding(tokens, embedding_dim, padding_idx,
                                    div_half_dim=False):
    """Pallas-backed equivalent of SinusoidalPositionalEmbedding.forward."""
    b, s = tokens.shape
    assert embedding_dim % 2 == 0, "embedding_dim must be even"
    half = embedding_dim // 2
    if not div_half_dim:
        assert half > 1, "embedding_dim must be > 2 when div_half_dim=False"
        scale = math.log(10000.0) / (half - 1)
    else:
        scale = math.log(10000.0) / half

    tokens = tokens.astype(jnp.int32)
    # make_positions: cumsum(mask) * mask + padding_idx  (cheap, stays in XLA)
    mask = (tokens != padding_idx).astype(jnp.int32)
    positions = jnp.cumsum(mask, axis=1) * mask + padding_idx        # int32

    tb, ts, s_pad, vmem_limit = _choose_tiling(b, s, embedding_dim)

    if s_pad != s:
        positions = jnp.pad(positions, ((0, 0), (0, s_pad - s)),
                            constant_values=padding_idx)
    positions = positions.reshape(b, s_pad, 1)

    # inverse frequencies, computed once in the wrapper (hoisted out of kernel)
    inv_freq = jnp.exp(
        jnp.arange(half, dtype=jnp.float32) * jnp.float32(-scale)
    ).reshape(1, 1, half)

    grid = (b // tb, s_pad // ts)
    kernel = partial(spe_kernel, padding_idx=int(padding_idx))

    out_bytes = b * s_pad * embedding_dim * 4
    cost = pl.CostEstimate(
        flops=3 * b * s_pad * embedding_dim,
        transcendentals=b * s_pad * embedding_dim,
        bytes_accessed=out_bytes + b * s_pad * 4 + half * 4,
    )

    # TODO(synk): make_grid2d / dynamic table regrowth of the PyTorch module are
    # host-side conveniences and are not part of this forward kernel.
    out = pl.pallas_call(
        kernel,
        out_shape=jax.ShapeDtypeStruct((b, s_pad, embedding_dim), jnp.float32),
        grid_spec=pltpu.PrefetchScalarGridSpec(
            num_scalar_prefetch=0,
            grid=grid,
            in_specs=[
                pl.BlockSpec((tb, ts, 1), lambda i, j: (i, j, 0)),   # positions
                pl.BlockSpec((1, 1, half), lambda i, j: (0, 0, 0)),  # inv_freq
            ],
            out_specs=pl.BlockSpec((tb, ts, embedding_dim),
                                   lambda i, j: (i, j, 0)),
        ),
        compiler_params=pltpu.CompilerParams(
            dimension_semantics=("parallel", "parallel"),
            vmem_limit_bytes=vmem_limit,
        ),
        cost_estimate=cost,
    )(positions, inv_freq)

    if s_pad != s:
        out = out[:, :s, :]
    return out


def reference_forward(tokens_np, embedding_dim, padding_idx, init_size=1024,
                      div_half_dim=False):
    """Pure-numpy mirror of the PyTorch module (table + index_select)."""
    half = embedding_dim // 2
    scale = (np.log(10000.0) / (half - 1)) if not div_half_dim \
        else (np.log(10000.0) / half)
    freqs = np.exp(np.arange(half, dtype=np.float32) * -scale)
    table = np.arange(init_size, dtype=np.float32)[:, None] * freqs[None, :]
    table = np.concatenate([np.sin(table), np.cos(table)], axis=1)
    table[padding_idx, :] = 0.0
    mask = (tokens_np != padding_idx).astype(np.int64)
    positions = np.cumsum(mask, axis=1) * mask + padding_idx
    return table[positions]                                      # (B, S, D)


def _check(tokens, D, padding_idx):
    out = jax.block_until_ready(
        sinusoidal_positional_embedding(tokens, D, padding_idx))
    ref = reference_forward(np.asarray(tokens), D, padding_idx)
    assert out.shape == ref.shape, (out.shape, ref.shape)
    assert np.allclose(np.asarray(out), ref, atol=1e-5, rtol=1e-5), \
        f"mismatch vs reference (D={D}, shape={tokens.shape})"


if __name__ == "__main__":
    padding_idx = 0
    key = jax.random.PRNGKey(0)
    k1, k2, k3 = jax.random.split(key, 3)

    # small demo shape (concat fallback path, D < 128)
    tokens = jax.random.randint(k1, (2, 8), 0, 6, dtype=jnp.int32)
    _check(tokens, 32, padding_idx)

    # S not a multiple of 8 -> exercises the padding + slice path
    tokens2 = jax.random.randint(k2, (2, 10), 0, 6, dtype=jnp.int32)
    _check(tokens2, 32, padding_idx)

    # half == 128 -> exercises the lane-aligned split-store path
    tokens3 = jax.random.randint(k3, (2, 8), 0, 6, dtype=jnp.int32)
    _check(tokens3, 256, padding_idx)

    print("KERNEL_OK")
</pallas_src>

<mosaic_0001>
module attributes {stable_mosaic.version = 11 : i64} {
  func.func @spe_kernel(%arg0: i32, %arg1: i32, %arg2: memref<1x8x1xi32, #tpu.memory_space<vmem>>, %arg3: memref<1x1x16xf32, #tpu.memory_space<vmem>>, %arg4: memref<1x8x32xf32, #tpu.memory_space<vmem>>) attributes {dimension_semantics = [#tpu.dimension_semantics<parallel>, #tpu.dimension_semantics<parallel>], iteration_bounds = array<i64: 2, 1>, scalar_prefetch = 0 : i64, scratch_operands = 0 : i64, tpu.core_type = #tpu.core_type<tc>, window_params = [{transform_indices = @transform_0, window_bounds = array<i64: 1, 8, 1>}, {pipeline_mode = #tpu.pipeline_mode<synchronous>, transform_indices = @transform_1, window_bounds = array<i64: 1, 1, 16>}, {transform_indices = @transform_2, window_bounds = array<i64: 1, 8, 32>}]} {
    %c0 = arith.constant 0 : index
    %c0_0 = arith.constant 0 : index
    %c0_1 = arith.constant 0 : index
    %0 = vector.load %arg2[%c0, %c0_0, %c0_1] : memref<1x8x1xi32, #tpu.memory_space<vmem>>, vector<1x8x1xi32>
    %c0_i32 = arith.constant 0 : i32
    %1 = vector.broadcast %c0_i32 : i32 to vector<1x8x1xi32>
    %2 = arith.cmpi ne, %0, %1 : vector<1x8x1xi32>
    %3 = arith.extui %2 : vector<1x8x1xi1> to vector<1x8x1xi32>
    %4 = arith.sitofp %3 : vector<1x8x1xi32> to vector<1x8x1xf32>
    %5 = arith.sitofp %0 : vector<1x8x1xi32> to vector<1x8x1xf32>
    %c0_2 = arith.constant 0 : index
    %c0_3 = arith.constant 0 : index
    %c0_4 = arith.constant 0 : index
    %6 = vector.load %arg3[%c0_2, %c0_3, %c0_4] : memref<1x1x16xf32, #tpu.memory_space<vmem>>, vector<1x1x16xf32>
    %7 = vector.broadcast %5 : vector<1x8x1xf32> to vector<1x8x16xf32>
    %8 = vector.broadcast %6 : vector<1x1x16xf32> to vector<1x8x16xf32>
    %9 = arith.mulf %7, %8 : vector<1x8x16xf32>
    %10 = math.sin %9 : vector<1x8x16xf32>
    %11 = vector.broadcast %4 : vector<1x8x1xf32> to vector<1x8x16xf32>
    %12 = arith.mulf %10, %11 : vector<1x8x16xf32>
    %13 = math.cos %9 : vector<1x8x16xf32>
    %14 = vector.broadcast %4 : vector<1x8x1xf32> to vector<1x8x16xf32>
    %15 = arith.mulf %13, %14 : vector<1x8x16xf32>
    %16 = tpu.concatenate %12, %15 in 2 : vector<1x8x16xf32>, vector<1x8x16xf32> -> vector<1x8x32xf32>
    %c0_5 = arith.constant 0 : index
    %c0_6 = arith.constant 0 : index
    %c0_7 = arith.constant 0 : index
    %17 = vector.load %arg4[%c0_5, %c0_6, %c0_7] : memref<1x8x32xf32, #tpu.memory_space<vmem>>, vector<1x8x32xf32>
    tpu.vector_store %arg4[%c0_5, %c0_6, %c0_7], %16 {strides = array<i32>} : memref<1x8x32xf32, #tpu.memory_space<vmem>>, vector<1x8x32xf32>,
    return
  }
  func.func @transform_0(%arg0: i32, %arg1: i32) -> (i32, i32, i32) {
    %c0_i32 = arith.constant 0 : i32
    %c0_i32_0 = arith.constant 0 : i32
    return %arg0, %arg1, %c0_i32 : i32, i32, i32
  }
  func.func @transform_1(%arg0: i32, %arg1: i32) -> (i32, i32, i32) {
    %c0_i32 = arith.constant 0 : i32
    %c0_i32_0 = arith.constant 0 : i32
    %c0_i32_1 = arith.constant 0 : i32
    %c0_i32_2 = arith.constant 0 : i32
    return %c0_i32, %c0_i32_0, %c0_i32_1 : i32, i32, i32
  }
  func.func @transform_2(%arg0: i32, %arg1: i32) -> (i32, i32, i32) {
    %c0_i32 = arith.constant 0 : i32
    %c0_i32_0 = arith.constant 0 : i32
    return %arg0, %arg1, %c0_i32 : i32, i32, i32
  }
}

</mosaic_0001>

<bundles_post_ra>
// kernel: tpu_custom_call.1
= control target key start
LH: loop header
LB: loop body
LE: loop exit
PB: predicated region body
PF: predicated region fallthrough
CT: control target
= control target key end

     0   :  { %7 = vsyncpa [#allocation3], 0  ;;  %s930_s0 = inlined_call_operand.vmem [shape: s32[2,8,1], index: 0, kind: input, shape index: {}]   ;;  %s931_s1 = inlined_call_operand.vmem [shape: f32[1,1,16], index: 1, kind: input, shape index: {}]   ;;  %s932_s2 = inlined_call_operand.hbm [shape: f32[2,8,32], index: 2, kind: output, shape index: {}]  }
   0x1   :  { %9 = vsyncpa [#allocation3 + $0x1], 0  ;;  %s779_s9 = smov 0   ;;  %s781_s10 = smov 0  }
   0x2   :  { %s783_s11 = smov 0   ;;  %s785_s12 = smov 0  }
   0x3   :  { %s787_s13 = smov 0   ;;  %s789_s14 = smov 0  }
   0x4 LB: > { %s591_s15 = sadd.s32 4294967295, %s753_s14   ;;  %s592_s16 = sadd.s32 4294967294, %s753_s14   ;;  %s753_s14 = sphi %s789_s14, %s15_s14   ;;  %s749_s13 = sphi %s787_s13, %s939_s13   ;;  %s745_s12 = sphi %s785_s12, %s938_s12   ;;  %s741_s11 = sphi %s783_s11, %s937_s11   ;;  %s737_s10 = sphi %s781_s10, %s936_s10   ;;  %s733_s9 = sphi %s779_s9, %s935_s9  }
   0x5   : > { %s27_s17 = sadd.s32 1, %s749_s13  ;;  %s85_s18 = sadd.s32 1, %s741_s11 }
   0x6   : > { %p29_p0 = scmp.ge.s32.totalorder %s27_s17, 2  ;;  %p95_p1 = scmp.ne.s32.totalorder %s741_s11, %s737_s10 }
   0x7   : > { %p96_p2 = scmp.eq.s32.totalorder %s591_s15, 1  ;;  %p101_p3 = scmp.ne.s32.totalorder %s737_s10, %s733_s9 }
   0x8   : > { %s941_s17 = smov (%p29_p0, %s27_s17), 0  ;;  %p102_p5 = scmp.eq.s32.totalorder %s592_s16, 1 }
   0x9   : > { %p819_p4 = por %p96_p2, %p95_p1  ;;  %s80_s20 = ssub.s32 %s749_s13, %s941_s17 }
   0xa   : > { %p595_p6 = scmp.ge.s32.totalorder %s753_s14, 1  ;;  %p83_p7 = scmp.eq.s32.totalorder %s80_s20, 0 }
   0xb   : > { %p826_p8 = por %p102_p5, %p101_p3  ;;  %p133_p9 = scmp.lt.s32.totalorder %s753_s14, 3 }
   0xc   : > { %s832_s22 = scalar_select %p83_p7, %s741_s11, %s85_s18  }
   0xd   : > { %p134_p10 = pnand %p595_p6, %p133_p9 }
   0xe   : > { %p157_p11 = scmp.lt.s32.totalorder (!%p134_p10), %s745_s12, 1  ;;  %s763_s30 = smov (!%p134_p10), 16  }
   0xf   : > { %137 = sbr.rel (%p134_p10) target bundleno = 361 (0x169), region = 28  ;;  %s154_s3 = sand.u32 (!%p134_p10), 1, %s737_s10  }
  0x10   : > { %s596_s4 = sshll.u32 (!%p134_p10), %s154_s3, 3  ;;  %s606_s5 = sshll.u32 (!%p134_p10), %s745_s12, 3 }
  0x11   : > { %s515_s8 = scalar_lea.hbm (!%p134_p10), %s932_s2, %s606_s5  ;;  %s156_s15 = scalar_lea.vmem (!%p134_p10), [#allocation2], %s596_s4 }
  0x12   : > { %s517_s16 = sshll.u32 (!%p134_p10), %s156_s15, 4  ;;  %s519_s18 = sshll.u32 (!%p134_p10), %s515_s8, 4  ;;  %s518_s16 = int_to_ptr.vmem [resolvable:$true] %s517_s16  ;;  %s520_s18 = int_to_ptr.hbm [resolvable:$true] %s519_s18 }
  0x13   : > { %s504_s20 = scalar_lea.sflag (!%p134_p10), [#allocation3], %s154_s3  ;;  %s695_s26 = scalar_lea.hbm (!%p134_p10), %s932_s2, 16 }
  0x14   : > { %v755_v0 = vmov 0   ;;  %s158_s23 = scalar_select %p157_p11, %s745_s12, 1  ;;  %v756_v3 = vmov 0.0   ;;  %v674_v5 = vld [vmem:[%s931_s1] ss:$0 sm:$0xff] }
  0x15   : > { %673 = vset.pattern.permute.xlu0 %v755_v0  ;;  %v757_v19 = vmov 683565275   ;;  %v758_v21 = vmov 2475754826   ;;  %v759_v23 = vmov 2131351028  }
  0x16   : > { %s597_s24 = sshll.u32 %s158_s23, 3  ;;  %v760_v25 = vmov 2102212464   ;;  %v761_v30 = vmov 920167782   ;;  %s689_s23 = sshra.s32 %s520_s18, 4  ;;  %s690_s23 = int_to_ptr.hbm [resolvable:$true] %s689_s23 }
  0x17   : > { %s163_s27 = scalar_lea.vmem %s930_s0, %s597_s24  ;;  %v762_v33 = vmov 1326507024   ;;  %s691_s24 = scalar_lea.hbm %s690_s23, 8 }
  0x18   : > { %v164_v1 = vld [vmem:[%s163_s27] sm:$0xff]  ;;  %p692_p12 = scmp.ne.s32.totalorder %s690_s23, %s691_s24  ;;  %p696_p1 = scmp.lt.s32.totalorder %s690_s23, %s932_s2 }
  0x19   : > { %v168_v2 = vcvt.s32.f32 %v164_v1  ;;  %vm165_vm0 = vcmp.ne.s32.totalorder %v164_v1, 0  ;;  %p697_p2 = scmp.lt.s32.totalorder %s695_s26, %s691_s24 }
  0x1a   : > { %v598_v4 = vsel %vm165_vm0, 1.0, %v756_v3  ;;  %p693_p13 = pnand %p692_p12, %p819_p4 }
  0x1b   : > { %172 = vperm.xlu0 %673, %v168_v2   ;;  %p698_p3 = por %p697_p2, %p696_p1 }
  0x1c   : > { %p694_p0 = pneg %p693_p13 }
  0x1e   : > { %p699_p5 = pnand %p698_p3, %p694_p0 }
  0x23   : > { %336 = vperm.xlu0 %673, %v598_v4  }
  0x8d   : > { %v173_v6 = vpop.permute.xlu0 %172 }
  0x8e   : > { %v843_v7 = vmul.f32 %v674_v5, %v173_v6 }
  0x90   : > { %v182_v8 = vand.u32 2139095040, %v843_v7  ;;  %v179_v10 = vand.u32 2147483647, %v843_v7  ;;  %vm181_vm13 = vcmp.lt.s32.totalorder %v843_v7, 0 }
  0x92   : > { %v183_v9 = vshrl.u32 %v182_v8, 23  ;;  %v186_v13 = vand.u32 8388607, %v179_v10  ;;  %vm180_vm14 = vcmp.le.f32.partialorder %v179_v10, 0.7853982 }
  0x94   : > { %v599_v11 = vadd.s32 4294967169, %v183_v9  ;;  %v187_v16 = vor.u32 8388608, %v186_v13 }
  0x96   : > { %v189_v12 = vadd.s32 1, %v599_v11  ;;  %v851_v35 = vshll.u32 %v187_v16, 8 }
  0x98   : > { %vm190_vm1 = vcmp.gt.s32.totalorder %v189_v12, 0  ;;  %v228_v47 = vand.u32 65535, %v851_v35  ;;  %v229_v49 = vshrl.u32 %v851_v35, 16 }
  0x99   : > { %v191_v14 = vsel %vm190_vm1, %v189_v12, 0 }
  0x9a   : > { %v193_v15 = vand.u32 31, %v191_v14  ;;  %v849_v17 = vshrl.u32 %v191_v14, 5 }
  0x9c   : > { %v194_v18 = vsub.s32 32, %v193_v15  ;;  %v196_v20 = vshll.u32 %v757_v19, %v193_v15  ;;  %v199_v22 = vshll.u32 %v758_v21, %v193_v15  ;;  %v202_v24 = vshll.u32 %v759_v23, %v193_v15 }
  0x9d   : > { %v205_v26 = vshll.u32 %v760_v25, %v193_v15  ;;  %v208_v32 = vshll.u32 %v761_v30, %v193_v15  ;;  %vm211_vm2 = vcmp.lt.s32.totalorder %v849_v17, 1  ;;  %vm214_vm3 = vcmp.lt.s32.totalorder %v849_v17, 4 }
  0x9e   : > { %v197_v27 = vshrl.u32 %v758_v21, %v194_v18  ;;  %v200_v28 = vshrl.u32 %v759_v23, %v194_v18  ;;  %v203_v29 = vshrl.u32 %v760_v25, %v194_v18  ;;  %v206_v31 = vshrl.u32 %v761_v30, %v194_v18 }
  0x9f   : > { %v209_v34 = vshrl.u32 %v762_v33, %v194_v18  ;;  %vm213_vm4 = vcmp.lt.s32.totalorder %v849_v17, 3  ;;  %vm212_vm5 = vcmp.lt.s32.totalorder %v849_v17, 2  ;;  %v195_v12 = vshrl.u32 %v757_v19, %v194_v18 }
  0xa0   : > { %v198_v36 = vor.u32 %v197_v27, %v196_v20  ;;  %v201_v37 = vor.u32 %v200_v28, %v199_v22  ;;  %v204_v38 = vor.u32 %v203_v29, %v202_v24  ;;  %v207_v39 = vor.u32 %v206_v31, %v205_v26 }
  0xa1   : > { %v210_v40 = vor.u32 %v209_v34, %v208_v32 }
  0xa2   : > { %v219_v41 = vsel %vm211_vm2, %v198_v36, %v201_v37  ;;  %v220_v42 = vsel %vm214_vm3, %v207_v39, 920167782  ;;  %v223_v43 = vsel %vm211_vm2, %v201_v37, %v204_v38  ;;  %v216_v8 = vsel %vm214_vm3, %v204_v38, 2102212464 }
  0xa3   : > { %v221_v44 = vsel %vm213_vm4, %v204_v38, %v220_v42  ;;  %v224_v45 = vsel %vm214_vm3, %v210_v40, 1326507024  ;;  %v215_v21 = vsel %vm211_vm2, %v195_v12, %v198_v36  ;;  %v217_v22 = vsel %vm213_vm4, %v201_v37, %v216_v8 }
  0xa4   : > { %v225_v46 = vsel %vm213_vm4, %v207_v39, %v224_v45  ;;  %v222_v48 = vsel %vm212_vm5, %v219_v41, %v221_v44  ;;  %v218_v19 = vsel %vm212_vm5, %v215_v21, %v217_v22 }
  0xa5   : > { %v226_v50 = vsel %vm212_vm5, %v223_v43, %v225_v46  ;;  %v252_v51 = vand.u32 65535, %v222_v48  ;;  %v253_v52 = vshrl.u32 %v222_v48, 16  ;;  %v272_v31 = vmul.u32 %v851_v35, %v218_v19 }
  0xa6   : > { %v230_v53 = vand.u32 65535, %v226_v50  ;;  %v231_v54 = vshrl.u32 %v226_v50, 16  ;;  %vm322_vm5 = vweird.f32 %v843_v7 }
  0xa7   : > { %v255_v55 = vmul.u32 %v253_v52, %v228_v47  ;;  %v256_v56 = vmul.u32 %v252_v51, %v229_v49  ;;  %v254_v59 = vmul.u32 %v252_v51, %v228_v47  ;;  %v257_v63 = vmul.u32 %v253_v52, %v229_v49 }
  0xa8   : > { %v233_v57 = vmul.u32 %v231_v54, %v228_v47  ;;  %v234_v58 = vmul.u32 %v230_v53, %v229_v49  ;;  %v232_v61 = vmul.u32 %v230_v53, %v228_v47  ;;  %v235_v1 = vmul.u32 %v231_v54, %v229_v49 }
  0xa9   : > { %v258_v60 = vshll.u32 %v255_v55, 16  ;;  %v260_v2 = vshll.u32 %v256_v56, 16  ;;  %v259_v16 = vshrl.u32 %v255_v55, 16  ;;  %v261_v25 = vshrl.u32 %v256_v56, 16 }
  0xaa   : > { %v236_v62 = vshll.u32 %v233_v57, 16  ;;  %v238_v4 = vshll.u32 %v234_v58, 16  ;;  %v237_v23 = vshrl.u32 %v233_v57, 16  ;;  %v239_v27 = vshrl.u32 %v234_v58, 16 }
  0xab   : > { %vm262_vm6 = vc.u32 %v254_v59, %v258_v60  ;;  %v264_v3 = vadd.s32 %v258_v60, %v254_v59 }
  0xac   : > { %vm240_vm7 = vc.u32 %v232_v61, %v236_v62  ;;  %v242_v5 = vadd.s32 %v236_v62, %v232_v61  ;;  %v263_v6 = vsel %vm262_vm6, 1, %v755_v0  ;;  %vm499_vm6 = vcmask 130048  }
  0xad   : > { %v241_v9 = vsel %vm240_vm7, 1, %v755_v0  ;;  %v265_v11 = vadd.s32 %v263_v6, %v257_v63  ;;  %vm266_vm8 = vc.u32 %v264_v3, %v260_v2  ;;  %vm501_vm7 = vcmask 261120  }
  0xae   : > { %v243_v13 = vadd.s32 %v241_v9, %v235_v1  ;;  %vm244_vm9 = vc.u32 %v242_v5, %v238_v4  ;;  %v267_v14 = vsel %vm266_vm8, 1, %v755_v0 }
  0xaf   : > { %v245_v15 = vsel %vm244_vm9, 1, %v755_v0  ;;  %v269_v20 = vadd.s32 %v267_v14, %v265_v11  ;;  %v268_v0 = vadd.s32 %v264_v3, %v260_v2 }
  0xb0   : > { %v247_v24 = vadd.s32 %v245_v15, %v243_v13 }
  0xb1   : > { %v270_v26 = vadd.s32 %v269_v20, %v259_v16 }
  0xb2   : > { %v248_v18 = vadd.s32 %v247_v24, %v237_v23 }
  0xb3   : > { %v271_v28 = vadd.s32 %v270_v26, %v261_v25 }
  0xb4   : > { %v249_v29 = vadd.s32 %v248_v18, %v239_v27  ;;  %v337_v18 = vpop.permute.xlu0 %336 }
  0xb5   : > { %v275_v30 = vadd.s32 1, %v271_v28 }
  0xb6   : > { %vm274_vm10 = vc.u32 %v249_v29, %v268_v0  ;;  %v273_v43 = vadd.s32 %v268_v0, %v249_v29 }
  0xb7   : > { %v276_v32 = vsel %vm274_vm10, %v275_v30, %v271_v28 }
  0xb8   : > { %v277_v33 = vadd.s32 %v276_v32, %v272_v31 }
  0xba   : > { %v278_v34 = vadd.s32 536870912, %v277_v33 }
  0xbc   : > { %v279_v36 = vshrl.u32 %v278_v34, 30 }
  0xbe   : > { %v280_v37 = vshll.u32 %v279_v36, 30  ;;  %v303_v55 = vsub.s32 4, %v279_v36 }
  0xc0   : > { %v281_v38 = vsub.s32 %v277_v33, %v280_v37  ;;  %v304_v59 = vsel %vm181_vm13, %v303_v55, %v279_v36 }
  0xc1   : > { %v306_v62 = vsel %vm180_vm14, 0, %v304_v59 }
  0xc2   : > { %vm282_vm11 = vcmp.lt.s32.totalorder %v281_v38, 0  ;;  %v283_v39 = vsub.s32 0, %v281_v38  ;;  %v323_v4 = vadd.s32 3, %v306_v62  ;;  %v484_v13 = vand.u32 3, %v306_v62 }
  0xc4   : > { %v284_v40 = vsel %vm282_vm11, %v283_v39, %v281_v38  ;;  %v324_v11 = vand.u32 3, %v323_v4  ;;  %vm485_vm1 = vcmp.lt.s32.totalorder %v484_v13, 2  ;;  %vm486_vm2 = vcmp.eq.s32.totalorder %v484_v13, 0 }
  0xc5   : > { %v285_v41 = vclz %v284_v40  ;;  %vm489_vm3 = vcmp.eq.s32.totalorder %v484_v13, 2 }
  0xc6   : > { %vm329_vm15 = vcmp.eq.s32.totalorder %v324_v11, 2  ;;  %vm326_vm0 = vcmp.eq.s32.totalorder %v324_v11, 0  ;;  %vm325_vm4 = vcmp.lt.s32.totalorder %v324_v11, 2 }
  0xc7   : > { %v600_v42 = vadd.s32 4294967294, %v285_v41 }
  0xc9   : > { %vm601_vm12 = vcmp.lt.s32.totalorder %v600_v42, 0 }
  0xca   : > { %v288_v17 = vsel %vm601_vm12, 0, %v600_v42 }
  0xcb   : > { %v289_v44 = vsub.s32 32, %v288_v17  ;;  %v293_v45 = vsub.s32 4294967266, %v288_v17  ;;  %v290_v46 = vshll.u32 %v281_v38, %v288_v17 }
  0xcd   : > { %v291_v47 = vshrl.u32 %v273_v43, %v289_v44  ;;  %v294_v35 = vadd.s32 127, %v293_v45 }
  0xcf   : > { %v292_v48 = vor.u32 %v291_v47, %v290_v46  ;;  %v295_v49 = vshll.u32 %v294_v35, 23 }
  0xd1   : > { %v296_v50 = vor.u32 4788187, %v295_v49  ;;  %v299_v52 = vcvt.s32.f32 %v292_v48 }
  0xd3   : > { %v297_v51 = vand.u32 2147483647, %v296_v50 }
  0xd5   : > { %v300_v53 = vmul.f32 %v299_v52, %v297_v51 }
  0xd7   : > { %v301_v54 = vxor.u32 2147483648, %v300_v53 }
  0xd9   : > { %v302_v56 = vsel %vm181_vm13, %v301_v54, %v300_v53 }
  0xda   : > { %v305_v57 = vsel %vm180_vm14, %v843_v7, %v302_v56 }
  0xdb   : > { %v307_v58 = vmul.f32 %v305_v57, %v305_v57 }
  0xdd   : > { %v308_v60 = vmul.f32 -0.001358992, %v307_v58  ;;  %v315_v61 = vmul.f32 -0.00019511016, %v307_v58 }
  0xdf   : > { %v309_v63 = vadd.f32 0.041655596, %v308_v60  ;;  %v316_v1 = vadd.f32 0.008332121, %v315_v61 }
  0xe1   : > { %v310_v2 = vmul.f32 %v309_v63, %v307_v58  ;;  %v317_v3 = vmul.f32 %v316_v1, %v307_v58 }
  0xe3   : > { %v311_v5 = vadd.f32 -0.4999988, %v310_v2  ;;  %v318_v6 = vadd.f32 -0.16666654, %v317_v3 }
  0xe5   : > { %v312_v8 = vmul.f32 %v311_v5, %v307_v58  ;;  %v319_v9 = vmul.f32 %v318_v6, %v307_v58 }
  0xe7   : > { %v313_v12 = vadd.f32 1.0, %v312_v8  ;;  %v320_v10 = vadd.f32 1.0, %v319_v9 }
  0xe9   : > { %v321_v14 = vmul.f32 %v320_v10, %v305_v57  ;;  %v330_v15 = vxor.u32 2147483648, %v313_v12 }
  0xeb   : > { %v327_v16 = vxor.u32 2147483648, %v321_v14  ;;  %v331_v20 = vsel %vm329_vm15, %v330_v15, %v321_v14  ;;  %v491_v23 = vsel %vm489_vm3, %v330_v15, %v321_v14 }
  0xed   : > { %v328_v21 = vsel %vm326_vm0, %v313_v12, %v327_v16  ;;  %v488_v22 = vsel %vm486_vm2, %v313_v12, %v327_v16 }
  0xee   : > { %v332_v24 = vsel %vm325_vm4, %v328_v21, %v331_v20  ;;  %v492_v25 = vsel %vm485_vm1, %v488_v22, %v491_v23 }
  0xef   : > { %v333_v26 = vsel %vm322_vm5, nan, %v332_v24  ;;  %v493_v27 = vsel %vm322_vm5, nan, %v492_v25 }
  0xf0   : > { %v339_v19 = vmul.f32 %v337_v18, %v333_v26  ;;  %v494_v28 = vmul.f32 %v493_v27, %v337_v18 }
  0xf2   : > { %496 = vrot.lane.b32.xlu1 %v494_v28, %s763_s30 }
 0x164   : > { %v497_v7 = vpop.permute.xlu1 %496 }
 0x165   : > { %v500_v29 = vsel %vm499_vm6, %v339_v19, %v497_v7 }
 0x166   : > { %502 = vst.msk [vmem:[%s156_s15] sm:$0xff] %vm501_vm7, %v500_v29 }
 0x167   : > { %702 = shalt.err (!%p699_p5)
}
 0x168   : > { %609 = dma.vmem_to_hbm [thread:$0]  (%p819_p4), %s518_s16, 128, %s520_s18, %s504_s20  }
 0x169 PF: > { %p615_p6 = scmp.ge.s32.totalorder %s753_s14, 2  ;;  %s531_s29 = sand.u32 1, %s733_s9  }
 0x16a   : > { %s532_s30 = scalar_lea.sflag [#allocation3], %s531_s29 }
 0x16b   : > { %p612_p7 = pnand %p615_p6, %p826_p8 }
 0x16d   : > { %p613_p9 = pneg %p612_p7 }
 0x16f   : > { %728 = dma.done.wait (%p613_p9), %s532_s30, 128  }
 0x170   : > { %730 = vsyncadd (%p613_p9), %s532_s30, 4294967168  ;;  %s15_s14 = sadd.s32 1, %s753_s14   ;;  %s935_s9 = smov %s737_s10 }
 0x171   : > { %p12_p10 = scmp.ge.s32.totalorder %s15_s14, 4   ;;  %s936_s10 = smov %s741_s11 }
 0x172   : > { %s937_s11 = smov %s832_s22  ;;  %s938_s12 = smov %s749_s13 }
 0x173   : > { %s939_s13 = smov %s941_s17  ;;  %14 = sbr.rel (!%p12_p10) target bundleno = 4 (0x4), region = 63 }
 0x178   :  { %538 = vsyncpa [#allocation3], 1 }
 0x179   :  { %540 = vsyncpa [#allocation3 + $0x1], 1 }

</bundles_post_ra>
